<compile_context>
chip_gen: v7x
topology: tpu7x:2x2x1
jax: 0.10.0
libtpu: 0.0.40
codegen_flags: <defaults>
</compile_context>

<pallas_src>
import functools
import math

import jax
import jax.numpy as jnp
from jax import lax
from jax.experimental import pallas as pl
from jax.experimental.pallas import tpu as pltpu

_EPS = 1e-5


# ----------------------------- kernel helpers --------------------------------
def _bn_train(v, gamma, beta, eps=_EPS):
    """Training-mode batch norm on a (N, C, P) value (P = flattened pixels).

    Two-pass statistics (mean, then centered variance) to avoid the
    cancellation of the E[x^2]-E[x]^2 form; biased variance like PyTorch.
    """
    m = float(v.shape[0] * v.shape[2])
    mu = jnp.sum(v, axis=(0, 2), keepdims=True) * (1.0 / m)
    d = v - mu
    var = jnp.sum(d * d, axis=(0, 2), keepdims=True) * (1.0 / m)
    return d * (lax.rsqrt(var + eps) * gamma) + beta


def _conv3x3_same(v, h, w, wtap):
    """Full-resolution 3x3 'same' per-channel conv of a (N, C, H*W) value.

    The flattened spatial axis sits on the 128 lanes, so every tap is a
    lane-dense static slice of the value zero-padded by (w+1) on that axis.
    The only artefact of the flattened padding is the horizontal wrap-around
    at the image's left/right edge, removed with one lane mask per kw (the
    mask does not depend on kh, so there are only two selects in total).

    wtap: (9, C, 1) per-channel tap weights (k = 3*kh + kw), or None for
    all-ones taps (used by the avg-pool branch).
    """
    n, c, hw = v.shape
    zpad = jnp.zeros((n, c, w + 1), v.dtype)
    vp = jnp.concatenate([zpad, v, zpad], axis=-1)        # (N, C, HW + 2w + 2)
    col = lax.broadcasted_iota(jnp.int32, (1, 1, hw), 2) % w
    acc = jnp.zeros((n, c, hw), jnp.float32)
    for kw in range(3):
        part = jnp.zeros((n, c, hw), jnp.float32)
        for kh in range(3):
            k = 3 * kh + kw
            s = (w + 1) + (kh - 1) * w + (kw - 1)         # static slice start
            tap = vp[:, :, s:s + hw]
            part = part + (tap if wtap is None else tap * wtap[k])
        if kw == 0:
            part = jnp.where(col >= 1, part, 0.0)
        elif kw == 2:
            part = jnp.where(col <= w - 2, part, 0.0)
        acc = acc + part
    return acc


def _downsample2x2(v, h, w):
    """Keep the stride-2 sample points (even rows / even cols) of (N, C, H*W)."""
    n, c, _ = v.shape
    v = v.reshape(n, c, h // 2, 2, w // 2, 2)
    return v[:, :, :, 0, :, 0].reshape(n, c, (h // 2) * (w // 2))


# --------------------------------- kernel ------------------------------------
def _inverted_residual_kernel(x_ref, w1_ref, g1_ref, b1_ref, dw_ref, g2_ref,
                              b2_ref, w2_ref, g3_ref, b3_ref, o_ref,
                              *, h, w, stride):
    n, cin, _ = x_ref.shape
    hid = w1_ref.shape[0]
    oce = w2_ref.shape[0]                                  # outc_eff

    x = x_ref[...]                                         # (N, Cin, H*W) f32

    # ---- branch2_p1: grouped 1x1 conv (channel_shuffle folded into its output
    # rows) -> BN -> ReLU.  bf16 operands / f32 accumulation on the MXU; the
    # result keeps pixels on the lane axis so all following VPU math is dense.
    w1b = jnp.broadcast_to(w1_ref[...], (n, hid, cin))
    y = jnp.einsum("ndc,ncp->ndp", w1b, x.astype(jnp.bfloat16),
                   preferred_element_type=jnp.float32)     # (N, hid, H*W)
    y = jnp.maximum(_bn_train(y, g1_ref[...], b1_ref[...]), 0.0)

    # ---- branch2_p2[0:2]: depthwise 3x3 (padding=1, stride s) -> BN.
    # Evaluated at full resolution in the lane-dense layout; for stride 2 the
    # stride-2 sample points are kept via a pure value reshape (cheaper than
    # parity-gathering each of the 9 taps at these sizes, single code path).
    dwv = _conv3x3_same(y, h, w, dw_ref[...])
    if stride == 2:
        dwv = _downsample2x2(dwv, h, w)
    z = _bn_train(dwv, g2_ref[...], b2_ref[...])

    # ---- branch2_p2[2:]: grouped(2) 1x1 conv fused into ONE block-diagonal
    # (outc_eff, hid) matmul, followed by a single BN pass.
    w2b = jnp.broadcast_to(w2_ref[...], (n, oce, hid))
    r2 = jnp.einsum("noc,ncp->nop", w2b, z.astype(jnp.bfloat16),
                    preferred_element_type=jnp.float32)    # (N, outc_eff, P')
    r2 = _bn_train(r2, g3_ref[...], b3_ref[...])

    # ---- merge with branch1; ONE full-width store of the output slab.
    if stride == 1:
        o_ref[...] = x + r2                                # identity + residual
    else:
        # branch1: AvgPool2d(3, stride=2, padding=1), count_include_pad=True.
        pool = _downsample2x2(_conv3x3_same(x, h, w, None), h, w) * (1.0 / 9.0)
        # Channel concat happens on the sublane axis of the *value*; the store
        # itself is a single unmasked slab.
        o_ref[...] = jnp.concatenate([pool, r2], axis=1)


# ----------------------------- wrapper (glue) ---------------------------------
def _grouped_1x1_to_dense(wt, groups):
    """(cout, cin//groups, 1, 1) grouped 1x1 conv weight -> dense (cin, cout)."""
    cout = wt.shape[0]
    w2 = wt[:, :, 0, 0]
    opg = cout // groups
    blocks = [w2[g * opg:(g + 1) * opg].T for g in range(groups)]
    return jax.scipy.linalg.block_diag(*blocks).astype(jnp.float32)


def prepare_params(params, *, groups):
    """One-time parameter preprocessing (layout glue, hoisted out of the
    per-call path; in a real network this runs once at weight-load time)."""
    hid = params["w1"].shape[0]
    outc_eff = params["w2"].shape[0]
    oc2 = outc_eff // 2

    # conv1 as a dense (hid, cin) matrix with channel_shuffle(., 2) folded
    # into its output-channel rows, plus its BN params in the same order.
    w1d = _grouped_1x1_to_dense(params["w1"], groups)               # (cin, hid)
    perm = jnp.array([i1 * (hid // 2) + i2
                      for i2 in range(hid // 2) for i1 in range(2)])
    w1t = jnp.transpose(w1d[:, perm]).astype(jnp.bfloat16)          # (hid, cin)
    g1 = params["g1"][perm].reshape(1, hid, 1).astype(jnp.float32)
    b1 = params["b1"][perm].reshape(1, hid, 1).astype(jnp.float32)

    # Depthwise 3x3 weights as (kh*3+kw, channel, 1), f32 (VPU path).
    dwp = jnp.transpose(params["wdw"][:, 0], (1, 2, 0)).reshape(9, hid, 1)
    dwp = dwp.astype(jnp.float32)

    g2 = params["g2"].reshape(1, hid, 1).astype(jnp.float32)
    b2 = params["b2"].reshape(1, hid, 1).astype(jnp.float32)

    # Second grouped(2) 1x1 conv fused into ONE block-diagonal (outc_eff, hid).
    w2 = params["w2"][:, :, 0, 0]                                   # (outc_eff, hid//2)
    w2t = jax.scipy.linalg.block_diag(w2[:oc2], w2[oc2:]).astype(jnp.bfloat16)
    g3 = params["g3"].reshape(1, outc_eff, 1).astype(jnp.float32)
    b3 = params["b3"].reshape(1, outc_eff, 1).astype(jnp.float32)
    return (w1t, g1, b1, dwp, g2, b2, w2t, g3, b3)


def _vmem_limit_bytes(resident_bytes):
    # Generation-aware VMEM budget instead of a hard 32 MiB clamp:
    # v5e/v6e have 128 MiB physical VMEM, v7x 64 MiB per TensorCore.
    cap = 64 * 2 ** 20
    try:
        cap = int(pltpu.get_tpu_info().vmem_capacity_bytes)
    except Exception:        # not running on real TPU hardware (e.g. interpret)
        pass
    want = max(16 * 2 ** 20, 8 * resident_bytes)
    return int(min(want, cap - 16 * 2 ** 20))


@functools.partial(jax.jit, static_argnames=("stride",))
def inverted_residual_forward(x_nchw, prepped, *, stride):
    """Forward pass of the ShuffleNet InvertedResidual block (NCHW in/out).

    The kernel consumes/produces NCHW with the spatial dims flattened onto the
    lane axis, so the wrapper only performs metadata reshapes (no transposes).
    """
    n, cin, h, w = x_nchw.shape
    w1t, g1, b1, dwp, g2, b2, w2t, g3, b3 = prepped
    oce = w2t.shape[0]

    ho, wo = (h, w) if stride == 1 else (h // 2, w // 2)
    out_c = oce if stride == 1 else cin + oce

    x = x_nchw.reshape(n, cin, h * w).astype(jnp.float32)

    inputs = (x, w1t, g1, b1, dwp, g2, b2, w2t, g3, b3)
    out_shape = jax.ShapeDtypeStruct((n, out_c, ho * wo), jnp.float32)

    resident = (sum(a.size * a.dtype.itemsize for a in inputs)
                + math.prod(out_shape.shape) * 4)

    # Whole arrays live in VMEM; with no grid there is nothing to pipeline, so
    # the inputs are not double-buffered either.
    # TODO(synk): for real (large) inputs this should become a batch/row-tiled
    # "parallel" grid (2 TCs on v7x) with a separate pass / accumulation axis
    # for the global training-mode BN statistics, which cannot be computed per
    # tile.
    vspec = pl.BlockSpec(memory_space=pltpu.MemorySpace.VMEM)
    out = pl.pallas_call(
        functools.partial(_inverted_residual_kernel, h=h, w=w, stride=stride),
        out_shape=out_shape,
        in_specs=[vspec] * len(inputs),
        out_specs=vspec,
        compiler_params=pltpu.CompilerParams(
            vmem_limit_bytes=_vmem_limit_bytes(resident)),
    )(*inputs)
    return out.reshape(n, out_c, ho, wo)                            # still NCHW


# ------------------------- pure-JAX reference (check) -------------------------
def _bn_train_nchw(v, gamma, beta, eps=_EPS):
    mu = jnp.mean(v, axis=(0, 2, 3), keepdims=True)
    var = jnp.mean(jnp.square(v - mu), axis=(0, 2, 3), keepdims=True)
    return (v - mu) / jnp.sqrt(var + eps) * gamma.reshape(1, -1, 1, 1) \
        + beta.reshape(1, -1, 1, 1)


def reference_forward(x, p, *, stride, groups):
    """Reference with the same bf16-operand / f32-accumulate matmul precision
    as the kernel, so the comparison isolates kernel bugs rather than MXU
    rounding."""
    dn = ("NCHW", "OIHW", "NCHW")
    bf16, f32 = jnp.bfloat16, jnp.float32
    r2 = lax.conv_general_dilated(
        x.astype(bf16), p["w1"].astype(bf16), (1, 1), "VALID",
        feature_group_count=groups, dimension_numbers=dn,
        preferred_element_type=f32)
    r2 = jnp.maximum(_bn_train_nchw(r2, p["g1"], p["b1"]), 0.0)
    n, c, h, w = r2.shape
    r2 = r2.reshape(n, 2, c // 2, h, w).transpose(0, 2, 1, 3, 4).reshape(n, c, h, w)
    r2 = lax.conv_general_dilated(
        r2, p["wdw"], (stride, stride), ((1, 1), (1, 1)),
        feature_group_count=c, dimension_numbers=dn,
        precision=lax.Precision.HIGHEST)
    r2 = _bn_train_nchw(r2, p["g2"], p["b2"])
    r2 = lax.conv_general_dilated(
        r2.astype(bf16), p["w2"].astype(bf16), (1, 1), "VALID",
        feature_group_count=2, dimension_numbers=dn,
        preferred_element_type=f32)
    r2 = _bn_train_nchw(r2, p["g3"], p["b3"])
    if stride > 1:
        s = lax.reduce_window(x, 0.0, lax.add, (1, 1, 3, 3), (1, 1, 2, 2),
                              ((0, 0), (0, 0), (1, 1), (1, 1)))
        return jnp.concatenate([s / 9.0, r2], axis=1)
    return x + r2


# ------------------------------ parameters ------------------------------------
def make_params(key, inc, outc, stride, groups):
    hid = outc // 4
    outc_eff = outc - inc if stride > 1 else outc
    ks = jax.random.split(key, 9)

    def conv_w(k, shape, fan_in):
        return jax.random.normal(k, shape, jnp.float32) / (float(fan_in) ** 0.5)

    return dict(
        w1=conv_w(ks[0], (hid, inc // groups, 1, 1), inc // groups),
        g1=jax.random.uniform(ks[1], (hid,), jnp.float32, 0.5, 1.5),
        b1=0.1 * jax.random.normal(ks[2], (hid,), jnp.float32),
        wdw=conv_w(ks[3], (hid, 1, 3, 3), 9),
        g2=jax.random.uniform(ks[4], (hid,), jnp.float32, 0.5, 1.5),
        b2=0.1 * jax.random.normal(ks[5], (hid,), jnp.float32),
        w2=conv_w(ks[6], (outc_eff, hid // 2, 1, 1), hid // 2),
        g3=jax.random.uniform(ks[7], (outc_eff,), jnp.float32, 0.5, 1.5),
        b3=0.1 * jax.random.normal(ks[8], (outc_eff,), jnp.float32),
    )


# ---------------------------------- main ---------------------------------------
if __name__ == "__main__":
    key = jax.random.PRNGKey(0)
    n, h, w = 2, 16, 16
    configs = [
        dict(inc=16, outc=16, stride=1, groups=2),   # identity branch + residual add
        dict(inc=16, outc=32, stride=2, groups=2),   # avg-pool branch + channel concat
    ]
    for cfg in configs:
        key, kp, kx = jax.random.split(key, 3)
        params = make_params(kp, **cfg)
        x = jax.random.normal(kx, (n, cfg["inc"], h, w), jnp.float32)

        prepped = prepare_params(params, groups=cfg["groups"])      # one-time glue
        out = inverted_residual_forward(x, prepped, stride=cfg["stride"])
        out = jax.block_until_ready(out)

        ref = reference_forward(x, params, stride=cfg["stride"], groups=cfg["groups"])
        assert out.shape == ref.shape, (out.shape, ref.shape)
        err = float(jnp.max(jnp.abs(out - ref)))
        if not err < 5e-2:
            raise SystemExit(f"Pallas/reference mismatch (max abs err = {err})")
    print("KERNEL_OK")
</pallas_src>

<mosaic_0001>
module attributes {stable_mosaic.version = 11 : i64} {
  func.func @_inverted_residual_kernel(%arg0: memref<2x16x256xf32, #tpu.memory_space<vmem>>, %arg1: memref<4x16xbf16, #tpu.memory_space<vmem>>, %arg2: memref<1x4x1xf32, #tpu.memory_space<vmem>>, %arg3: memref<1x4x1xf32, #tpu.memory_space<vmem>>, %arg4: memref<9x4x1xf32, #tpu.memory_space<vmem>>, %arg5: memref<1x4x1xf32, #tpu.memory_space<vmem>>, %arg6: memref<1x4x1xf32, #tpu.memory_space<vmem>>, %arg7: memref<16x4xbf16, #tpu.memory_space<vmem>>, %arg8: memref<1x16x1xf32, #tpu.memory_space<vmem>>, %arg9: memref<1x16x1xf32, #tpu.memory_space<vmem>>, %arg10: memref<2x16x256xf32, #tpu.memory_space<vmem>>) attributes {dimension_semantics = [], scalar_prefetch = 0 : i64, scratch_operands = 0 : i64, tpu.core_type = #tpu.core_type<tc>} {
    %c0 = arith.constant 0 : index
    %c0_0 = arith.constant 0 : index
    %c0_1 = arith.constant 0 : index
    %0 = vector.load %arg0[%c0, %c0_0, %c0_1] : memref<2x16x256xf32, #tpu.memory_space<vmem>>, vector<2x16x256xf32>
    %c0_2 = arith.constant 0 : index
    %c0_3 = arith.constant 0 : index
    %1 = vector.load %arg1[%c0_2, %c0_3] : memref<4x16xbf16, #tpu.memory_space<vmem>>, vector<4x16xbf16>
    %2 = vector.shape_cast %1 : vector<4x16xbf16> to vector<1x4x16xbf16>
    %3 = vector.broadcast %2 : vector<1x4x16xbf16> to vector<2x4x16xbf16>
    %4 = arith.truncf %0 : vector<2x16x256xf32> to vector<2x16x256xbf16>
    "tpu.trace_start"() <{level = 10 : i32, message = "ndc,ncp->ndp"}> : () -> ()
    %cst = arith.constant dense<0.000000e+00> : vector<2x4x256xf32>
    %5 = tpu.matmul %3, %4, %cst {dimension_numbers = #tpu.dot_dimension_numbers<[2], [1], [1], [2], [0, 0, 0, 1, 1, 2], [0], [0]>} : vector<2x4x16xbf16>, vector<2x16x256xbf16>, vector<2x4x256xf32> -> vector<2x4x256xf32>
    "tpu.trace_stop"() : () -> ()
    %c0_4 = arith.constant 0 : index
    %c0_5 = arith.constant 0 : index
    %c0_6 = arith.constant 0 : index
    %6 = vector.load %arg2[%c0_4, %c0_5, %c0_6] : memref<1x4x1xf32, #tpu.memory_space<vmem>>, vector<1x4x1xf32>
    %c0_7 = arith.constant 0 : index
    %c0_8 = arith.constant 0 : index
    %c0_9 = arith.constant 0 : index
    %7 = vector.load %arg3[%c0_7, %c0_8, %c0_9] : memref<1x4x1xf32, #tpu.memory_space<vmem>>, vector<1x4x1xf32>
    %cst_10 = arith.constant dense<0.000000e+00> : vector<4xf32>
    %8 = vector.multi_reduction <add>, %5, %cst_10 [0, 2] : vector<2x4x256xf32> to vector<4xf32>
    %9 = vector.shape_cast %8 : vector<4xf32> to vector<1x4x1xf32>
    %cst_11 = arith.constant 0.001953125 : f32
    %10 = vector.broadcast %cst_11 : f32 to vector<1x4x1xf32>
    %11 = arith.mulf %9, %10 : vector<1x4x1xf32>
    %12 = vector.broadcast %11 : vector<1x4x1xf32> to vector<2x4x256xf32>
    %13 = arith.subf %5, %12 : vector<2x4x256xf32>
    %14 = arith.mulf %13, %13 : vector<2x4x256xf32>
    %cst_12 = arith.constant dense<0.000000e+00> : vector<4xf32>
    %15 = vector.multi_reduction <add>, %14, %cst_12 [0, 2] : vector<2x4x256xf32> to vector<4xf32>
    %16 = vector.shape_cast %15 : vector<4xf32> to vector<1x4x1xf32>
    %cst_13 = arith.constant 0.001953125 : f32
    %17 = vector.broadcast %cst_13 : f32 to vector<1x4x1xf32>
    %18 = arith.mulf %16, %17 : vector<1x4x1xf32>
    %cst_14 = arith.constant 9.99999974E-6 : f32
    %19 = vector.broadcast %cst_14 : f32 to vector<1x4x1xf32>
    %20 = arith.addf %18, %19 : vector<1x4x1xf32>
    %21 = math.rsqrt %20 : vector<1x4x1xf32>
    %22 = arith.mulf %21, %6 : vector<1x4x1xf32>
    %23 = vector.broadcast %22 : vector<1x4x1xf32> to vector<2x4x256xf32>
    %24 = arith.mulf %13, %23 : vector<2x4x256xf32>
    %25 = vector.broadcast %7 : vector<1x4x1xf32> to vector<2x4x256xf32>
    %26 = arith.addf %24, %25 : vector<2x4x256xf32>
    %cst_15 = arith.constant 0.000000e+00 : f32
    %27 = vector.broadcast %cst_15 : f32 to vector<2x4x256xf32>
    %28 = arith.maximumf %26, %27 : vector<2x4x256xf32>
    %c0_16 = arith.constant 0 : index
    %c0_17 = arith.constant 0 : index
    %c0_18 = arith.constant 0 : index
    %29 = vector.load %arg4[%c0_16, %c0_17, %c0_18] : memref<9x4x1xf32, #tpu.memory_space<vmem>>, vector<9x4x1xf32>
    %cst_19 = arith.constant 0.000000e+00 : f32
    %30 = vector.broadcast %cst_19 : f32 to vector<2x4x17xf32>
    %31 = tpu.concatenate %30, %28, %30 in 2 : vector<2x4x17xf32>, vector<2x4x256xf32>, vector<2x4x17xf32> -> vector<2x4x290xf32>
    %32 = tpu.iota {dimensions = array<i32: 2>} : vector<1x1x256xi32>
    %c16_i32 = arith.constant 16 : i32
    %c0_i32 = arith.constant 0 : i32
    %33 = arith.cmpi eq, %c16_i32, %c0_i32 : i32
    %c1_i32 = arith.constant 1 : i32
    %34 = arith.select %33, %c1_i32, %c16_i32 : i32
    %35 = vector.broadcast %34 : i32 to vector<1x1x256xi32>
    %36 = arith.remsi %32, %35 : vector<1x1x256xi32>
    %c0_i32_20 = arith.constant 0 : i32
    %37 = vector.broadcast %c0_i32_20 : i32 to vector<1x1x256xi32>
    %38 = arith.cmpi ne, %36, %37 : vector<1x1x256xi32>
    %c0_i32_21 = arith.constant 0 : i32
    %39 = vector.broadcast %c0_i32_21 : i32 to vector<1x1x256xi32>
    %40 = arith.cmpi slt, %36, %39 : vector<1x1x256xi32>
    %c0_i32_22 = arith.constant 0 : i32
    %41 = arith.cmpi slt, %34, %c0_i32_22 : i32
    %42 = vector.broadcast %41 : i1 to vector<1x1x256xi1>
    %43 = vector.broadcast %42 : vector<1x1x256xi1> to vector<1x1x256xi1>
    %44 = arith.xori %40, %43 : vector<1x1x256xi1>
    %45 = arith.andi %44, %38 : vector<1x1x256xi1>
    %46 = vector.broadcast %34 : i32 to vector<1x1x256xi32>
    %47 = arith.addi %36, %46 : vector<1x1x256xi32>
    %48 = arith.select %45, %47, %36 : vector<1x1x256xi1>, vector<1x1x256xi32>
    %cst_23 = arith.constant 0.000000e+00 : f32
    %49 = vector.broadcast %cst_23 : f32 to vector<2x4x256xf32>
    %cst_24 = arith.constant 0.000000e+00 : f32
    %50 = vector.broadcast %cst_24 : f32 to vector<2x4x256xf32>
    %51 = vector.extract_strided_slice %31 {offsets = [0, 0, 0], sizes = [2, 4, 256], strides = [1, 1, 1]} : vector<2x4x290xf32> to vector<2x4x256xf32>
    %52 = vector.extract_strided_slice %29 {offsets = [0, 0, 0], sizes = [1, 4, 1], strides = [1, 1, 1]} : vector<9x4x1xf32> to vector<1x4x1xf32>
    %53 = vector.shape_cast %52 : vector<1x4x1xf32> to vector<4x1xf32>
    %54 = vector.shape_cast %53 : vector<4x1xf32> to vector<1x4x1xf32>
    %55 = vector.broadcast %54 : vector<1x4x1xf32> to vector<2x4x256xf32>
    %56 = arith.mulf %51, %55 : vector<2x4x256xf32>
    %57 = arith.addf %50, %56 : vector<2x4x256xf32>
    %58 = vector.extract_strided_slice %31 {offsets = [0, 0, 16], sizes = [2, 4, 256], strides = [1, 1, 1]} : vector<2x4x290xf32> to vector<2x4x256xf32>
    %59 = vector.extract_strided_slice %29 {offsets = [3, 0, 0], sizes = [1, 4, 1], strides = [1, 1, 1]} : vector<9x4x1xf32> to vector<1x4x1xf32>
    %60 = vector.shape_cast %59 : vector<1x4x1xf32> to vector<4x1xf32>
    %61 = vector.shape_cast %60 : vector<4x1xf32> to vector<1x4x1xf32>
    %62 = vector.broadcast %61 : vector<1x4x1xf32> to vector<2x4x256xf32>
    %63 = arith.mulf %58, %62 : vector<2x4x256xf32>
    %64 = arith.addf %57, %63 : vector<2x4x256xf32>
    %65 = vector.extract_strided_slice %31 {offsets = [0, 0, 32], sizes = [2, 4, 256], strides = [1, 1, 1]} : vector<2x4x290xf32> to vector<2x4x256xf32>
    %66 = vector.extract_strided_slice %29 {offsets = [6, 0, 0], sizes = [1, 4, 1], strides = [1, 1, 1]} : vector<9x4x1xf32> to vector<1x4x1xf32>
    %67 = vector.shape_cast %66 : vector<1x4x1xf32> to vector<4x1xf32>
    %68 = vector.shape_cast %67 : vector<4x1xf32> to vector<1x4x1xf32>
    %69 = vector.broadcast %68 : vector<1x4x1xf32> to vector<2x4x256xf32>
    %70 = arith.mulf %65, %69 : vector<2x4x256xf32>
    %71 = arith.addf %64, %70 : vector<2x4x256xf32>
    %c1_i32_25 = arith.constant 1 : i32
    %72 = vector.broadcast %c1_i32_25 : i32 to vector<1x1x256xi32>
    %73 = arith.cmpi sge, %48, %72 : vector<1x1x256xi32>
    %cst_26 = arith.constant 0.000000e+00 : f32
    %74 = vector.shape_cast %73 : vector<1x1x256xi1> to vector<1x1x256xi1>
    %75 = vector.broadcast %74 : vector<1x1x256xi1> to vector<2x4x256xi1>
    %76 = vector.broadcast %cst_26 : f32 to vector<2x4x256xf32>
    %77 = arith.select %75, %71, %76 : vector<2x4x256xi1>, vector<2x4x256xf32>
    %78 = arith.addf %49, %77 : vector<2x4x256xf32>
    %cst_27 = arith.constant 0.000000e+00 : f32
    %79 = vector.broadcast %cst_27 : f32 to vector<2x4x256xf32>
    %80 = vector.extract_strided_slice %31 {offsets = [0, 0, 1], sizes = [2, 4, 256], strides = [1, 1, 1]} : vector<2x4x290xf32> to vector<2x4x256xf32>
    %81 = vector.extract_strided_slice %29 {offsets = [1, 0, 0], sizes = [1, 4, 1], strides = [1, 1, 1]} : vector<9x4x1xf32> to vector<1x4x1xf32>
    %82 = vector.shape_cast %81 : vector<1x4x1xf32> to vector<4x1xf32>
    %83 = vector.shape_cast %82 : vector<4x1xf32> to vector<1x4x1xf32>
    %84 = vector.broadcast %83 : vector<1x4x1xf32> to vector<2x4x256xf32>
    %85 = arith.mulf %80, %84 : vector<2x4x256xf32>
    %86 = arith.addf %79, %85 : vector<2x4x256xf32>
    %87 = vector.extract_strided_slice %31 {offsets = [0, 0, 17], sizes = [2, 4, 256], strides = [1, 1, 1]} : vector<2x4x290xf32> to vector<2x4x256xf32>
    %88 = vector.extract_strided_slice %29 {offsets = [4, 0, 0], sizes = [1, 4, 1], strides = [1, 1, 1]} : vector<9x4x1xf32> to vector<1x4x1xf32>
    %89 = vector.shape_cast %88 : vector<1x4x1xf32> to vector<4x1xf32>
    %90 = vector.shape_cast %89 : vector<4x1xf32> to vector<1x4x1xf32>
    %91 = vector.broadcast %90 : vector<1x4x1xf32> to vector<2x4x256xf32>
    %92 = arith.mulf %87, %91 : vector<2x4x256xf32>
    %93 = arith.addf %86, %92 : vector<2x4x256xf32>
    %94 = vector.extract_strided_slice %31 {offsets = [0, 0, 33], sizes = [2, 4, 256], strides = [1, 1, 1]} : vector<2x4x290xf32> to vector<2x4x256xf32>
    %95 = vector.extract_strided_slice %29 {offsets = [7, 0, 0], sizes = [1, 4, 1], strides = [1, 1, 1]} : vector<9x4x1xf32> to vector<1x4x1xf32>
    %96 = vector.shape_cast %95 : vector<1x4x1xf32> to vector<4x1xf32>
    %97 = vector.shape_cast %96 : vector<4x1xf32> to vector<1x4x1xf32>
    %98 = vector.broadcast %97 : vector<1x4x1xf32> to vector<2x4x256xf32>
    %99 = arith.mulf %94, %98 : vector<2x4x256xf32>
    %100 = arith.addf %93, %99 : vector<2x4x256xf32>
    %101 = arith.addf %78, %100 : vector<2x4x256xf32>
    %cst_28 = arith.constant 0.000000e+00 : f32
    %102 = vector.broadcast %cst_28 : f32 to vector<2x4x256xf32>
    %103 = vector.extract_strided_slice %31 {offsets = [0, 0, 2], sizes = [2, 4, 256], strides = [1, 1, 1]} : vector<2x4x290xf32> to vector<2x4x256xf32>
    %104 = vector.extract_strided_slice %29 {offsets = [2, 0, 0], sizes = [1, 4, 1], strides = [1, 1, 1]} : vector<9x4x1xf32> to vector<1x4x1xf32>
    %105 = vector.shape_cast %104 : vector<1x4x1xf32> to vector<4x1xf32>
    %106 = vector.shape_cast %105 : vector<4x1xf32> to vector<1x4x1xf32>
    %107 = vector.broadcast %106 : vector<1x4x1xf32> to vector<2x4x256xf32>
    %108 = arith.mulf %103, %107 : vector<2x4x256xf32>
    %109 = arith.addf %102, %108 : vector<2x4x256xf32>
    %110 = vector.extract_strided_slice %31 {offsets = [0, 0, 18], sizes = [2, 4, 256], strides = [1, 1, 1]} : vector<2x4x290xf32> to vector<2x4x256xf32>
    %111 = vector.extract_strided_slice %29 {offsets = [5, 0, 0], sizes = [1, 4, 1], strides = [1, 1, 1]} : vector<9x4x1xf32> to vector<1x4x1xf32>
    %112 = vector.shape_cast %111 : vector<1x4x1xf32> to vector<4x1xf32>
    %113 = vector.shape_cast %112 : vector<4x1xf32> to vector<1x4x1xf32>
    %114 = vector.broadcast %113 : vector<1x4x1xf32> to vector<2x4x256xf32>
    %115 = arith.mulf %110, %114 : vector<2x4x256xf32>
    %116 = arith.addf %109, %115 : vector<2x4x256xf32>
    %117 = vector.extract_strided_slice %31 {offsets = [0, 0, 34], sizes = [2, 4, 256], strides = [1, 1, 1]} : vector<2x4x290xf32> to vector<2x4x256xf32>
    %118 = vector.extract_strided_slice %29 {offsets = [8, 0, 0], sizes = [1, 4, 1], strides = [1, 1, 1]} : vector<9x4x1xf32> to vector<1x4x1xf32>
    %119 = vector.shape_cast %118 : vector<1x4x1xf32> to vector<4x1xf32>
    %120 = vector.shape_cast %119 : vector<4x1xf32> to vector<1x4x1xf32>
    %121 = vector.broadcast %120 : vector<1x4x1xf32> to vector<2x4x256xf32>
    %122 = arith.mulf %117, %121 : vector<2x4x256xf32>
    %123 = arith.addf %116, %122 : vector<2x4x256xf32>
    %c14_i32 = arith.constant 14 : i32
    %124 = vector.broadcast %c14_i32 : i32 to vector<1x1x256xi32>
    %125 = arith.cmpi sle, %48, %124 : vector<1x1x256xi32>
    %cst_29 = arith.constant 0.000000e+00 : f32
    %126 = vector.shape_cast %125 : vector<1x1x256xi1> to vector<1x1x256xi1>
    %127 = vector.broadcast %126 : vector<1x1x256xi1> to vector<2x4x256xi1>
    %128 = vector.broadcast %cst_29 : f32 to vector<2x4x256xf32>
    %129 = arith.select %127, %123, %128 : vector<2x4x256xi1>, vector<2x4x256xf32>
    %130 = arith.addf %101, %129 : vector<2x4x256xf32>
    %c0_30 = arith.constant 0 : index
    %c0_31 = arith.constant 0 : index
    %c0_32 = arith.constant 0 : index
    %131 = vector.load %arg5[%c0_30, %c0_31, %c0_32] : memref<1x4x1xf32, #tpu.memory_space<vmem>>, vector<1x4x1xf32>
    %c0_33 = arith.constant 0 : index
    %c0_34 = arith.constant 0 : index
    %c0_35 = arith.constant 0 : index
    %132 = vector.load %arg6[%c0_33, %c0_34, %c0_35] : memref<1x4x1xf32, #tpu.memory_space<vmem>>, vector<1x4x1xf32>
    %cst_36 = arith.constant dense<0.000000e+00> : vector<4xf32>
    %133 = vector.multi_reduction <add>, %130, %cst_36 [0, 2] : vector<2x4x256xf32> to vector<4xf32>
    %134 = vector.shape_cast %133 : vector<4xf32> to vector<1x4x1xf32>
    %cst_37 = arith.constant 0.001953125 : f32
    %135 = vector.broadcast %cst_37 : f32 to vector<1x4x1xf32>
    %136 = arith.mulf %134, %135 : vector<1x4x1xf32>
    %137 = vector.broadcast %136 : vector<1x4x1xf32> to vector<2x4x256xf32>
    %138 = arith.subf %130, %137 : vector<2x4x256xf32>
    %139 = arith.mulf %138, %138 : vector<2x4x256xf32>
    %cst_38 = arith.constant dense<0.000000e+00> : vector<4xf32>
    %140 = vector.multi_reduction <add>, %139, %cst_38 [0, 2] : vector<2x4x256xf32> to vector<4xf32>
    %141 = vector.shape_cast %140 : vector<4xf32> to vector<1x4x1xf32>
    %cst_39 = arith.constant 0.001953125 : f32
    %142 = vector.broadcast %cst_39 : f32 to vector<1x4x1xf32>
    %143 = arith.mulf %141, %142 : vector<1x4x1xf32>
    %cst_40 = arith.constant 9.99999974E-6 : f32
    %144 = vector.broadcast %cst_40 : f32 to vector<1x4x1xf32>
    %145 = arith.addf %143, %144 : vector<1x4x1xf32>
    %146 = math.rsqrt %145 : vector<1x4x1xf32>
    %147 = arith.mulf %146, %131 : vector<1x4x1xf32>
    %148 = vector.broadcast %147 : vector<1x4x1xf32> to vector<2x4x256xf32>
    %149 = arith.mulf %138, %148 : vector<2x4x256xf32>
    %150 = vector.broadcast %132 : vector<1x4x1xf32> to vector<2x4x256xf32>
    %151 = arith.addf %149, %150 : vector<2x4x256xf32>
    %c0_41 = arith.constant 0 : index
    %c0_42 = arith.constant 0 : index
    %152 = vector.load %arg7[%c0_41, %c0_42] : memref<16x4xbf16, #tpu.memory_space<vmem>>, vector<16x4xbf16>
    %153 = vector.shape_cast %152 : vector<16x4xbf16> to vector<1x16x4xbf16>
    %154 = vector.broadcast %153 : vector<1x16x4xbf16> to vector<2x16x4xbf16>
    %155 = arith.truncf %151 : vector<2x4x256xf32> to vector<2x4x256xbf16>
    "tpu.trace_start"() <{level = 10 : i32, message = "noc,ncp->nop"}> : () -> ()
    %cst_43 = arith.constant dense<0.000000e+00> : vector<2x16x256xf32>
    %156 = tpu.matmul %154, %155, %cst_43 {dimension_numbers = #tpu.dot_dimension_numbers<[2], [1], [1], [2], [0, 0, 0, 1, 1, 2], [0], [0]>} : vector<2x16x4xbf16>, vector<2x4x256xbf16>, vector<2x16x256xf32> -> vector<2x16x256xf32>
    "tpu.trace_stop"() : () -> ()
    %c0_44 = arith.constant 0 : index
    %c0_45 = arith.constant 0 : index
    %c0_46 = arith.constant 0 : index
    %157 = vector.load %arg8[%c0_44, %c0_45, %c0_46] : memref<1x16x1xf32, #tpu.memory_space<vmem>>, vector<1x16x1xf32>
    %c0_47 = arith.constant 0 : index
    %c0_48 = arith.constant 0 : index
    %c0_49 = arith.constant 0 : index
    %158 = vector.load %arg9[%c0_47, %c0_48, %c0_49] : memref<1x16x1xf32, #tpu.memory_space<vmem>>, vector<1x16x1xf32>
    %cst_50 = arith.constant dense<0.000000e+00> : vector<16xf32>
    %159 = vector.multi_reduction <add>, %156, %cst_50 [0, 2] : vector<2x16x256xf32> to vector<16xf32>
    %160 = vector.shape_cast %159 : vector<16xf32> to vector<1x16x1xf32>
    %cst_51 = arith.constant 0.001953125 : f32
    %161 = vector.broadcast %cst_51 : f32 to vector<1x16x1xf32>
    %162 = arith.mulf %160, %161 : vector<1x16x1xf32>
    %163 = vector.broadcast %162 : vector<1x16x1xf32> to vector<2x16x256xf32>
    %164 = arith.subf %156, %163 : vector<2x16x256xf32>
    %165 = arith.mulf %164, %164 : vector<2x16x256xf32>
    %cst_52 = arith.constant dense<0.000000e+00> : vector<16xf32>
    %166 = vector.multi_reduction <add>, %165, %cst_52 [0, 2] : vector<2x16x256xf32> to vector<16xf32>
    %167 = vector.shape_cast %166 : vector<16xf32> to vector<1x16x1xf32>
    %cst_53 = arith.constant 0.001953125 : f32
    %168 = vector.broadcast %cst_53 : f32 to vector<1x16x1xf32>
    %169 = arith.mulf %167, %168 : vector<1x16x1xf32>
    %cst_54 = arith.constant 9.99999974E-6 : f32
    %170 = vector.broadcast %cst_54 : f32 to vector<1x16x1xf32>
    %171 = arith.addf %169, %170 : vector<1x16x1xf32>
    %172 = math.rsqrt %171 : vector<1x16x1xf32>
    %173 = arith.mulf %172, %157 : vector<1x16x1xf32>
    %174 = vector.broadcast %173 : vector<1x16x1xf32> to vector<2x16x256xf32>
    %175 = arith.mulf %164, %174 : vector<2x16x256xf32>
    %176 = vector.broadcast %158 : vector<1x16x1xf32> to vector<2x16x256xf32>
    %177 = arith.addf %175, %176 : vector<2x16x256xf32>
    %178 = arith.addf %0, %177 : vector<2x16x256xf32>
    %c0_55 = arith.constant 0 : index
    %c0_56 = arith.constant 0 : index
    %c0_57 = arith.constant 0 : index
    %179 = vector.load %arg10[%c0_55, %c0_56, %c0_57] : memref<2x16x256xf32, #tpu.memory_space<vmem>>, vector<2x16x256xf32>
    tpu.vector_store %arg10[%c0_55, %c0_56, %c0_57], %178 {strides = array<i32>} : memref<2x16x256xf32, #tpu.memory_space<vmem>>, vector<2x16x256xf32>,
    return
  }
}

</mosaic_0001>

<bundles_post_ra>
// kernel: inverted_residual_forward.1
= control target key start
LH: loop header
LB: loop body
LE: loop exit
PB: predicated region body
PF: predicated region fallthrough
CT: control target
= control target key end

     0   :  { %v952_v3 = vmov 0   ;;  %vm49_vm0 = vcmask 130048   ;;  %vm137_vm1 = vcmask 1043456   ;;  %vm212_vm2 = vcmask 138240   ;;  %s954_s29 = smov 112   ;;  %s955_s30 = smov 96   ;;  %s1371_s0 = inlined_call_operand.vmem [shape: f32[2,16,256], index: 0, kind: input, shape index: {}]   ;;  %s1372_s1 = inlined_call_operand.vmem [shape: bf16[4,16], index: 1, kind: input, shape index: {}]   ;;  %s1373_s4 = inlined_call_operand.vmem [shape: f32[9,4,1], index: 4, kind: input, shape index: {}]   ;;  %s1374_s2 = inlined_call_operand.vmem [shape: f32[1,4,1], index: 2, kind: input, shape index: {}]   ;;  %s1375_s3 = inlined_call_operand.vmem [shape: f32[1,4,1], index: 3, kind: input, shape index: {}]   ;;  %s1376_s6 = inlined_call_operand.vmem [shape: f32[1,4,1], index: 6, kind: input, shape index: {}]   ;;  %s1377_s5 = inlined_call_operand.vmem [shape: f32[1,4,1], index: 5, kind: input, shape index: {}]   ;;  %s1378_s7 = inlined_call_operand.vmem [shape: bf16[16,4], index: 7, kind: input, shape index: {}]   ;;  %s1379_s8 = inlined_call_operand.vmem [shape: f32[1,16,1], index: 8, kind: input, shape index: {}]   ;;  %s1380_s9 = inlined_call_operand.vmem [shape: f32[1,16,1], index: 9, kind: input, shape index: {}]   ;;  %s1381_s10 = inlined_call_operand.vmem [shape: f32[2,16,256], index: 10, kind: output, shape index: {}]  }
   0x1   :  { %v37_v0 = vld [vmem:[%s1371_s0 + $0x8] sm:$0xff]  ;;  %v39_v1 = vld [vmem:[%s1371_s0 + $0x18] sm:$0xff]  ;;  %85 = vmatprep.mubr.bf16.mxu0 %v952_v3  ;;  %126 = vmatprep.mubr.bf16.mxu1 %v952_v3  ;;  %v36_v6 = vld [vmem:[%s1371_s0] sm:$0xff]  ;;  %vm294_vm3 = vcmask 916480   ;;  %vm336_vm4 = vcmask 785408   ;;  %s957_s12 = smov 126  }
   0x2   :  { %v41_v2 = vld [vmem:[%s1371_s0 + $0x28] sm:$0xff]  ;;  %v46_v4 = vpack.c.bf16 %v39_v1, %v37_v0  ;;  %v43_v5 = vld [vmem:[%s1371_s0 + $0x38] sm:$0xff]  ;;  %v38_v7 = vld [vmem:[%s1371_s0 + $0x10] sm:$0xff]  ;;  %933 = vset.pattern.permute.xlu1 %v952_v3  ;;  %934 = vset.pattern.permute.xlu0 %v952_v3  ;;  %vm632_vm6 = vcmask 1031168   ;;  %vm488_vm7 = vcmask 1039360   ;;  %vm715_vm11 = vcmask 1041408  }
   0x3   :  { %v48_v8 = vpack.c.bf16 %v43_v5, %v41_v2  ;;  %v45_v9 = vpack.c.bf16 %v38_v7, %v36_v6  ;;  %v40_v10 = vld [vmem:[%s1371_s0 + $0x20] sm:$0xff]  ;;  %v42_v11 = vld [vmem:[%s1371_s0 + $0x30] sm:$0xff]  ;;  %v198_v55 = vld [vmem:[%s1373_s4 + $0x1c] sm:$0xf]  ;;  %vm711_vm12 = vcmask 31744  }
   0x4   :  { %53 = vmatprep.subr.bf16.mxu0 %v46_v4  ;;  %v47_v12 = vpack.c.bf16 %v42_v11, %v40_v10  ;;  %v44_v13 = vld [vmem:[%s1372_s1] sm:$0x3]  ;;  %v195_v46 = vld [vmem:[%s1373_s4 + $0x10] sm:$0xf]  ;;  %v196_v54 = vld [vmem:[%s1373_s4 + $0x14] sm:$0xf] }
   0x5   :  { %94 = vmatprep.subr.bf16.mxu1 %v48_v8  ;;  %54 = vmatpush1.bf16.msra.mxu0 %v45_v9  ;;  %v135_v50 = vld [vmem:[%s1374_s2] sm:$0xf]  ;;  %v194_v7 = vld [vmem:[%s1373_s4 + $0xc] sm:$0xf]  ;;  %v192_v8 = vld [vmem:[%s1373_s4 + $0x4] sm:$0xf] }
   0x6   :  { %95 = vmatpush1.bf16.msra.mxu1 %v47_v12  ;;  %v136_v53 = vld [vmem:[%s1375_s3] sm:$0xf]  ;;  %s953_s3 = smov 17   ;;  %v197_v9 = vld [vmem:[%s1373_s4 + $0x18] sm:$0xf] }
   0x7   :  { %v199_v56 = vld [vmem:[%s1373_s4 + $0x20] sm:$0xf]  ;;  %v193_v10 = vld [vmem:[%s1373_s4 + $0x8] sm:$0xf] }
   0x8   :  { %920 = vmatmul.mubr.msk.bf16.vlgmr.msra.gmra.mrb[0].mxu0 %vm49_vm0, %v44_v13 }
   0x9   :  { %921 = vmatmul.mubr.msk.bf16.vlgmr.msra.gmra.mrb[0].mxu1 %vm49_vm0, %v44_v13  ;;  %754 = vmatprep.mubr.bf16.mxu0 %v952_v3 }
   0xa   :  { %803 = vmatprep.mubr.bf16.mxu1 %v952_v3 }
  0xdb   :  { %v87_v14 = vpop.f32.mrb[0].mxu0 }
  0xdc   :  { %v138_v15 = vsel %vm137_vm1, %v87_v14, 0.0  ;;  %v128_v16 = vpop.f32.mrb[0].mxu1  ;;  %v89_v17 = vpop.f32.mrb[1].mxu0 }
  0xdd   :  { %v141_v18 = vsel %vm137_vm1, %v128_v16, 0.0  ;;  %v139_v19 = vsel %vm137_vm1, %v89_v17, 0.0  ;;  %v130_v20 = vpop.f32.mrb[1].mxu1  ;;  %v91_v21 = vpop.f32.mrb[2].mxu0 }
  0xde   :  { %v140_v22 = vadd.f32 %v139_v19, %v138_v15  ;;  %v132_v23 = vpop.f32.mrb[2].mxu1  ;;  %v92_v24 = vpop.f32.mrb[3].mxu0  ;;  %v143_v27 = vsel %vm137_vm1, %v130_v20, 0.0 }
  0xdf   :  { %v133_v25 = vpop.f32.mrb[3].mxu1 }
  0xe0   :  { %v142_v26 = vadd.f32 %v141_v18, %v140_v22 }
  0xe2   :  { %v144_v28 = vadd.f32 %v143_v27, %v142_v26 }
  0xe4   :  { %145 = vadd.xlane.f32.xlu0 %v144_v28 }
 0x171   :  { %v146_v29 = vpop.xlane.xlu0 %145 }
 0x172   :  { %v147_v30 = vmul.f32 0.001953125, %v146_v29 }
 0x174   :  { %v148_v31 = vsub.f32 %v87_v14, %v147_v30  ;;  %v149_v32 = vsub.f32 %v89_v17, %v147_v30  ;;  %v150_v33 = vsub.f32 %v128_v16, %v147_v30  ;;  %v151_v34 = vsub.f32 %v130_v20, %v147_v30 }
 0x176   :  { %v152_v35 = vmul.f32 %v148_v31, %v148_v31  ;;  %v153_v36 = vmul.f32 %v149_v32, %v149_v32  ;;  %v154_v37 = vmul.f32 %v150_v33, %v150_v33  ;;  %v155_v38 = vmul.f32 %v151_v34, %v151_v34 }
 0x178   :  { %v156_v39 = vsel %vm137_vm1, %v152_v35, 0.0  ;;  %v157_v40 = vsel %vm137_vm1, %v153_v36, 0.0  ;;  %v159_v42 = vsel %vm137_vm1, %v154_v37, 0.0  ;;  %v161_v44 = vsel %vm137_vm1, %v155_v38, 0.0 }
 0x179   :  { %v158_v41 = vadd.f32 %v157_v40, %v156_v39 }
 0x17b   :  { %v160_v43 = vadd.f32 %v159_v42, %v158_v41 }
 0x17d   :  { %v162_v45 = vadd.f32 %v161_v44, %v160_v43 }
 0x17f   :  { %163 = vadd.xlane.f32.xlu0 %v162_v45 }
 0x195   :  { %382 = vperm.xlu0 %934, %v195_v46  }
 0x20c   :  { %v164_v47 = vpop.xlane.xlu0 %163 }
 0x20d   :  { %v165_v48 = vmul.f32 0.001953125, %v164_v47 }
 0x20f   :  { %v166_v49 = vadd.f32 1e-05, %v165_v48 }
 0x211   :  { %936 = vrsqrt.f32 %v166_v49 }
 0x214   :  { %v383_v14 = vpop.permute.xlu0 %382 }
 0x21b   :  { %v937_v51 = vpop.eup %936 }
 0x21c   :  { %v168_v52 = vmul.f32 %v937_v51, %v135_v50 }
 0x21e   :  { %171 = vperm.xlu1 %933, %v168_v52   ;;  %v191_v52 = vld [vmem:[%s1373_s4] sm:$0xf]  ;;  %s956_s4 = smov 127  }
 0x222   :  { %180 = vperm.xlu1 %933, %v136_v53  }
 0x226   :  { %520 = vperm.xlu1 %933, %v196_v54  }
 0x22a   :  { %427 = vperm.xlu1 %933, %v198_v55  }
 0x22e   :  { %565 = vperm.xlu1 %933, %v199_v56  }
 0x29d   :  { %v172_v57 = vpop.permute.xlu1 %171 }
 0x29e   :  { %v174_v58 = vmul.f32 %v172_v57, %v148_v31  ;;  %v175_v60 = vmul.f32 %v172_v57, %v149_v32  ;;  %v176_v0 = vmul.f32 %v172_v57, %v150_v33  ;;  %v177_v3 = vmul.f32 %v172_v57, %v151_v34 }
 0x2a1   :  { %v181_v59 = vpop.permute.xlu1 %180 }
 0x2a2   :  { %v183_v61 = vadd.f32 %v181_v59, %v174_v58  ;;  %v184_v63 = vadd.f32 %v181_v59, %v175_v60  ;;  %v185_v2 = vadd.f32 %v181_v59, %v176_v0  ;;  %v186_v5 = vadd.f32 %v181_v59, %v177_v3 }
 0x2a4   :  { %v187_v62 = vmax.f32 %v183_v61, 0.0  ;;  %v188_v1 = vmax.f32 %v184_v63, 0.0  ;;  %v189_v4 = vmax.f32 %v185_v2, 0.0  ;;  %v190_v6 = vmax.f32 %v186_v5, 0.0 }
 0x2a5   :  { %v521_v11 = vpop.permute.xlu1 %520 }
 0x2a6   :  { %204 = vrot.lane.b32.xlu1 %v187_v62, %s953_s3 }
 0x2a9   :  { %v428_v12 = vpop.permute.xlu1 %427 }
 0x2aa   :  { %206 = vrot.lane.b32.xlu1 %v188_v1, %s953_s3 }
 0x2ad   :  { %v1078_v13 = vpop.permute.xlu1 %565 }
 0x2ae   :  { %208 = vrot.lane.b32.xlu1 %v189_v4, %s953_s3 }
 0x2b2   :  { %210 = vrot.lane.b32.xlu1 %v190_v6, %s953_s3 }
 0x2b6   :  { %267 = vperm.xlu1 %933, %v194_v7  }
 0x2ba   :  { %365 = vperm.xlu1 %933, %v192_v8  }
 0x2be   :  { %309 = vperm.xlu1 %933, %v197_v9  }
 0x2c2   :  { %503 = vperm.xlu1 %933, %v193_v10  }
 0x318   :  { %v205_v15 = vpop.permute.xlu1 %204 }
 0x319   :  { %v1081_v16 = vsel %vm212_vm2, 0.0, %v205_v15 }
 0x31a   :  { %v385_v17 = vmul.f32 %v383_v14, %v1081_v16  ;;  %v523_v24 = vmul.f32 %v521_v11, %v1081_v16  ;;  %v430_v34 = vmul.f32 %v428_v12, %v1081_v16  ;;  %v568_v42 = vmul.f32 %v1078_v13, %v1081_v16 }
 0x31c   :  { %v207_v18 = vpop.permute.xlu1 %206  ;;  %397 = vrot.lane.b32.xlu0 %v385_v17, %s954_s29 }
 0x31d   :  { %v1086_v19 = vsel %vm212_vm2, %v205_v15, %v207_v18  ;;  %v1089_v20 = vsel %vm212_vm2, %v207_v18, 0.0 }
 0x31e   :  { %v386_v21 = vmul.f32 %v383_v14, %v1086_v19  ;;  %v387_v22 = vmul.f32 %v383_v14, %v1089_v20  ;;  %v524_v25 = vmul.f32 %v521_v11, %v1086_v19  ;;  %v525_v28 = vmul.f32 %v521_v11, %v1089_v20 }
 0x31f   :  { %v431_v35 = vmul.f32 %v428_v12, %v1086_v19  ;;  %v432_v36 = vmul.f32 %v428_v12, %v1089_v20  ;;  %v569_v43 = vmul.f32 %v1078_v13, %v1086_v19  ;;  %v570_v46 = vmul.f32 %v1078_v13, %v1089_v20 }
 0x320   :  { %v209_v23 = vpop.permute.xlu1 %208  ;;  %399 = vrot.lane.b32.xlu1 %v386_v21, %s954_s29  ;;  %401 = vrot.lane.b32.xlu0 %v387_v22, %s954_s29 }
 0x321   :  { %v1098_v26 = vsel %vm212_vm2, 0.0, %v209_v23 }
 0x322   :  { %v388_v29 = vmul.f32 %v383_v14, %v1098_v26  ;;  %v526_v37 = vmul.f32 %v521_v11, %v1098_v26  ;;  %v433_v47 = vmul.f32 %v428_v12, %v1098_v26  ;;  %v571_v50 = vmul.f32 %v1078_v13, %v1098_v26 }
 0x324   :  { %v211_v27 = vpop.permute.xlu1 %210  ;;  %535 = vrot.lane.b32.xlu1 %v523_v24, %s954_s29  ;;  %537 = vrot.lane.b32.xlu0 %v524_v25, %s954_s29 }
 0x325   :  { %v1105_v30 = vsel %vm212_vm2, %v209_v23, %v211_v27  ;;  %v1108_v31 = vsel %vm212_vm2, %v211_v27, 0.0 }
 0x326   :  { %v389_v32 = vmul.f32 %v383_v14, %v1105_v30  ;;  %v390_v33 = vmul.f32 %v383_v14, %v1108_v31  ;;  %v527_v39 = vmul.f32 %v521_v11, %v1105_v30  ;;  %v528_v40 = vmul.f32 %v521_v11, %v1108_v31 }
 0x327   :  { %v434_v48 = vmul.f32 %v428_v12, %v1105_v30  ;;  %v435_v49 = vmul.f32 %v428_v12, %v1108_v31  ;;  %v572_v51 = vmul.f32 %v1078_v13, %v1105_v30  ;;  %v573_v53 = vmul.f32 %v1078_v13, %v1108_v31 }
 0x328   :  { %539 = vrot.lane.b32.xlu1 %v525_v28, %s954_s29  ;;  %403 = vrot.lane.b32.xlu0 %v388_v29, %s954_s29 }
 0x32c   :  { %405 = vrot.lane.b32.xlu1 %v389_v32, %s954_s29  ;;  %407 = vrot.lane.b32.xlu0 %v390_v33, %s954_s29 }
 0x330   :  { %442 = vrot.lane.b32.xlu1 %v430_v34, %s955_s30  ;;  %444 = vrot.lane.b32.xlu0 %v431_v35, %s955_s30 }
 0x334   :  { %446 = vrot.lane.b32.xlu1 %v432_v36, %s955_s30  ;;  %541 = vrot.lane.b32.xlu0 %v526_v37, %s954_s29 }
 0x335   :  { %v268_v38 = vpop.permute.xlu1 %267 }
 0x336   :  { %v270_v54 = vmul.f32 %v268_v38, %v1081_v16  ;;  %v271_v55 = vmul.f32 %v268_v38, %v1086_v19  ;;  %v272_v56 = vmul.f32 %v268_v38, %v1089_v20  ;;  %v273_v57 = vmul.f32 %v268_v38, %v1098_v26 }
 0x337   :  { %v274_v59 = vmul.f32 %v268_v38, %v1105_v30  ;;  %v275_v63 = vmul.f32 %v268_v38, %v1108_v31 }
 0x338   :  { %543 = vrot.lane.b32.xlu1 %v527_v39, %s954_s29  ;;  %545 = vrot.lane.b32.xlu0 %v528_v40, %s954_s29 }
 0x339   :  { %v1128_v41 = vpop.permute.xlu1 %365 }
 0x33a   :  { %v370_v44 = vmul.f32 %v1128_v41, %v1089_v20  ;;  %v1138_v45 = vmul.f32 %v1128_v41, %v1108_v31  ;;  %v369_v17 = vmul.f32 %v1128_v41, %v1086_v19 }
 0x33c   :  { %580 = vrot.lane.b32.xlu1 %v568_v42, %s955_s30  ;;  %582 = vrot.lane.b32.xlu0 %v569_v43, %s955_s30  ;;  %v368_v43 = vmul.f32 %v1128_v41, %v1081_v16 }
 0x33d   :  { %v310_v58 = vpop.permute.xlu1 %309 }
 0x33e   :  { %v312_v60 = vmul.f32 %v310_v58, %v1081_v16  ;;  %v313_v61 = vmul.f32 %v310_v58, %v1086_v19  ;;  %v314_v62 = vmul.f32 %v310_v58, %v1089_v20  ;;  %v315_v0 = vmul.f32 %v310_v58, %v1098_v26 }
 0x33f   :  { %v316_v1 = vmul.f32 %v310_v58, %v1105_v30  ;;  %v317_v2 = vmul.f32 %v310_v58, %v1108_v31 }
 0x340   :  { %584 = vrot.lane.b32.xlu1 %v570_v46, %s955_s30  ;;  %448 = vrot.lane.b32.xlu0 %v433_v47, %s955_s30 }
 0x341   :  { %v1187_v3 = vpop.permute.xlu1 %503 }
 0x342   :  { %v508_v34 = vmul.f32 %v1187_v3, %v1089_v20  ;;  %v507_v36 = vmul.f32 %v1187_v3, %v1086_v19  ;;  %v371_v20 = vmul.f32 %v1128_v41, %v1098_v26 }
 0x344   :  { %450 = vrot.lane.b32.xlu1 %v434_v48, %s955_s30  ;;  %452 = vrot.lane.b32.xlu0 %v435_v49, %s955_s30 }
 0x348   :  { %586 = vrot.lane.b32.xlu1 %v571_v50, %s955_s30  ;;  %588 = vrot.lane.b32.xlu0 %v572_v51, %s955_s30 }
 0x34c   :  { %590 = vrot.lane.b32.xlu1 %v573_v53, %s955_s30  ;;  %254 = vperm.xlu0 %934, %v191_v52  }
 0x350   :  { %282 = vrot.lane.b32.xlu1 %v270_v54, %s954_s29  ;;  %284 = vrot.lane.b32.xlu0 %v271_v55, %s954_s29  ;;  %v506_v55 = vmul.f32 %v1187_v3, %v1081_v16 }
 0x354   :  { %286 = vrot.lane.b32.xlu1 %v272_v56, %s954_s29  ;;  %288 = vrot.lane.b32.xlu0 %v273_v57, %s954_s29 }
 0x358   :  { %290 = vrot.lane.b32.xlu1 %v274_v59, %s954_s29  ;;  %324 = vrot.lane.b32.xlu0 %v312_v60, %s955_s30  ;;  %v509_v59 = vmul.f32 %v1187_v3, %v1098_v26 }
 0x35c   :  { %326 = vrot.lane.b32.xlu1 %v313_v61, %s955_s30  ;;  %328 = vrot.lane.b32.xlu0 %v314_v62, %s955_s30 }
 0x360   :  { %292 = vrot.lane.b32.xlu1 %v275_v63, %s954_s29  ;;  %330 = vrot.lane.b32.xlu0 %v315_v0, %s955_s30 }
 0x364   :  { %332 = vrot.lane.b32.xlu1 %v316_v1, %s955_s30 }
 0x368   :  { %334 = vrot.lane.b32.xlu1 %v317_v2, %s955_s30 }
 0x38e   :  { %v398_v4 = vpop.permute.xlu0 %397 }
 0x392   :  { %v400_v5 = vpop.permute.xlu1 %399  ;;  %v402_v6 = vpop.permute.xlu0 %401 }
 0x393   :  { %v410_v15 = vsel %vm294_vm3, %v400_v5, %v402_v6  ;;  %v421_v18 = vadd.f32 %v402_v6, %v370_v44  ;;  %v409_v38 = vsel %vm294_vm3, %v398_v4, %v400_v5  ;;  %v372_v4 = vmul.f32 %v1128_v41, %v1105_v30 }
 0x394   :  { %v420_v21 = vadd.f32 %v410_v15, %v369_v17  ;;  %v419_v50 = vadd.f32 %v409_v38, %v368_v43  ;;  %v510_v41 = vmul.f32 %v1187_v3, %v1105_v30 }
 0x396   :  { %v536_v7 = vpop.permute.xlu1 %535  ;;  %v538_v8 = vpop.permute.xlu0 %537 }
 0x397   :  { %v547_v51 = vsel %vm294_vm3, %v536_v7, %v538_v8 }
 0x398   :  { %v557_v62 = vadd.f32 %v547_v51, %v506_v55 }
 0x39a   :  { %v540_v9 = vpop.permute.xlu1 %539  ;;  %v404_v10 = vpop.permute.xlu0 %403 }
 0x39b   :  { %v548_v35 = vsel %vm294_vm3, %v538_v8, %v540_v9  ;;  %v559_v37 = vadd.f32 %v540_v9, %v508_v34 }
 0x39c   :  { %v558_v39 = vadd.f32 %v548_v35, %v507_v36 }
 0x39e   :  { %v406_v11 = vpop.permute.xlu1 %405  ;;  %v1189_v12 = vpop.permute.xlu0 %407 }
 0x39f   :  { %v411_v44 = vsel %vm294_vm3, %v404_v10, %v406_v11  ;;  %v412_v63 = vsel %vm294_vm3, %v406_v11, %v1189_v12  ;;  %v424_v10 = vadd.f32 %v1189_v12, %v1138_v45  ;;  %v511_v45 = vmul.f32 %v1187_v3, %v1108_v31 }
 0x3a0   :  { %v422_v52 = vadd.f32 %v411_v44, %v371_v20  ;;  %v423_v9 = vadd.f32 %v412_v63, %v372_v4  ;;  %v225_v3 = vlaneseq }
 0x3a2   :  { %v443_v13 = vpop.permute.xlu1 %442  ;;  %v445_v14 = vpop.permute.xlu0 %444 }
 0x3a3   :  { %v454_v48 = vsel %vm336_vm4, %v443_v13, %v445_v14 }
 0x3a4   :  { %v464_v56 = vadd.f32 %v454_v48, %v419_v50 }
 0x3a6   :  { %v447_v22 = vpop.permute.xlu1 %446  ;;  %v542_v23 = vpop.permute.xlu0 %541 }
 0x3a7   :  { %v455_v24 = vsel %vm336_vm4, %v445_v14, %v447_v22  ;;  %v466_v25 = vadd.f32 %v447_v22, %v421_v18 }
 0x3a8   :  { %v465_v27 = vadd.f32 %v455_v24, %v420_v21 }
 0x3a9   :  { %480 = vrot.lane.b32.xlu0 %v466_v25, %s956_s4 }
 0x3aa   :  { %v544_v28 = vpop.permute.xlu1 %543  ;;  %478 = vrot.lane.b32.xlu1 %v465_v27, %s956_s4  ;;  %v546_v29 = vpop.permute.xlu0 %545 }
 0x3ab   :  { %v549_v57 = vsel %vm294_vm3, %v542_v23, %v544_v28  ;;  %v550_v11 = vsel %vm294_vm3, %v544_v28, %v546_v29  ;;  %v562_v21 = vadd.f32 %v546_v29, %v511_v45 }
 0x3ac   :  { %v560_v0 = vadd.f32 %v549_v57, %v509_v59  ;;  %v561_v18 = vadd.f32 %v550_v11, %v510_v41 }
 0x3ae   :  { %v581_v32 = vpop.permute.xlu1 %580  ;;  %v583_v33 = vpop.permute.xlu0 %582 }
 0x3af   :  { %v592_v60 = vsel %vm336_vm4, %v581_v32, %v583_v33 }
 0x3b0   :  { %v602_v5 = vadd.f32 %v592_v60, %v557_v62 }
 0x3b2   :  { %v585_v40 = vpop.permute.xlu1 %584  ;;  %v449_v42 = vpop.permute.xlu0 %448 }
 0x3b3   :  { %v593_v46 = vsel %vm336_vm4, %v583_v33, %v585_v40  ;;  %v604_v47 = vadd.f32 %v585_v40, %v559_v37  ;;  %v226_v40 = vand.u32 127, %v225_v3 }
 0x3b4   :  { %v603_v49 = vadd.f32 %v593_v46, %v558_v39 }
 0x3b5   :  { %624 = vrot.lane.b32.xlu0 %v604_v47, %s957_s12  ;;  %v227_v44 = vadd.s32 128, %v226_v40  ;;  %v232_v47 = vand.u32 15, %v226_v40 }
 0x3b6   :  { %v451_v53 = vpop.permute.xlu1 %450  ;;  %622 = vrot.lane.b32.xlu1 %v603_v49, %s957_s12  ;;  %v453_v54 = vpop.permute.xlu0 %452 }
 0x3b7   :  { %v456_v58 = vsel %vm336_vm4, %v449_v42, %v451_v53  ;;  %v457_v7 = vsel %vm336_vm4, %v451_v53, %v453_v54  ;;  %v469_v15 = vadd.f32 %v453_v54, %v424_v10  ;;  %v239_v54 = vand.u32 15, %v227_v44 }
 0x3b8   :  { %v467_v61 = vadd.f32 %v456_v58, %v422_v52  ;;  %v468_v14 = vadd.f32 %v457_v7, %v423_v9  ;;  %vm1249_vm5 = vcmp.ge.s32.totalorder %v232_v47, 1  ;;  %vm1255_vm8 = vcmp.le.s32.totalorder %v232_v47, 14  ;;  %v650_v47 = vld [vmem:[%s1376_s6] sm:$0xf] }
 0x3b9   :  { %476 = vrot.lane.b32.xlu0 %v464_v56, %s956_s4  ;;  %vm1260_vm9 = vcmp.ge.s32.totalorder %v239_v54, 1  ;;  %vm1267_vm10 = vcmp.le.s32.totalorder %v239_v54, 14 }
 0x3ba   :  { %v587_v1 = vpop.permute.xlu1 %586  ;;  %482 = vrot.lane.b32.xlu1 %v467_v61, %s956_s4  ;;  %v589_v2 = vpop.permute.xlu0 %588 }
 0x3bb   :  { %v594_v6 = vsel %vm336_vm4, %v587_v1, %v589_v2 }
 0x3bc   :  { %v605_v8 = vadd.f32 %v594_v6, %v560_v0 }
 0x3bd   :  { %620 = vrot.lane.b32.xlu0 %v602_v5, %s957_s12 }
 0x3be   :  { %v591_v13 = vpop.permute.xlu1 %590  ;;  %626 = vrot.lane.b32.xlu1 %v605_v8, %s957_s12 }
 0x3bf   :  { %v595_v17 = vsel %vm336_vm4, %v589_v2, %v591_v13  ;;  %v607_v22 = vadd.f32 %v591_v13, %v562_v21 }
 0x3c0   :  { %v606_v12 = vadd.f32 %v595_v17, %v561_v18 }
 0x3c1   :  { %484 = vrot.lane.b32.xlu0 %v468_v14, %s956_s4 }
 0x3c2   :  { %486 = vrot.lane.b32.xlu1 %v469_v15, %s956_s4  ;;  %v283_v23 = vpop.permute.xlu1 %282 }
 0x3c5   :  { %628 = vrot.lane.b32.xlu0 %v606_v12, %s957_s12 }
 0x3c6   :  { %v287_v25 = vpop.permute.xlu1 %286 }
 0x3c9   :  { %630 = vrot.lane.b32.xlu0 %v607_v22, %s957_s12 }
 0x3ca   :  { %v291_v28 = vpop.permute.xlu1 %290 }
 0x3cb   :  { %v255_v24 = vpop.permute.xlu0 %254 }
 0x3cc   :  { %v257_v20 = vmul.f32 %v255_v24, %v1081_v16  ;;  %v258_v52 = vmul.f32 %v255_v24, %v1086_v19  ;;  %v259_v16 = vmul.f32 %v255_v24, %v1098_v26  ;;  %v260_v4 = vmul.f32 %v255_v24, %v1105_v30 }
 0x3ce   :  { %v327_v33 = vpop.permute.xlu1 %326 }
 0x3cf   :  { %v285_v27 = vpop.permute.xlu0 %284 }
 0x3d0   :  { %v295_v46 = vsel %vm294_vm3, %v283_v23, %v285_v27  ;;  %v296_v49 = vsel %vm294_vm3, %v285_v27, %v287_v25 }
 0x3d1   :  { %v303_v53 = vadd.f32 %v295_v46, %v257_v20  ;;  %v304_v58 = vadd.f32 %v296_v49, %v258_v52 }
 0x3d2   :  { %v293_v35 = vpop.permute.xlu1 %292 }
 0x3d3   :  { %v289_v32 = vpop.permute.xlu0 %288  ;;  %v298_v5 = vsel %vm294_vm3, %v291_v28, %v293_v35 }
 0x3d4   :  { %v297_v55 = vsel %vm294_vm3, %v289_v32, %v291_v28  ;;  %v306_v14 = vadd.f32 %v298_v5, %v260_v4 }
 0x3d5   :  { %v305_v0 = vadd.f32 %v297_v55, %v259_v16 }
 0x3d6   :  { %v333_v37 = vpop.permute.xlu1 %332 }
 0x3d7   :  { %v325_v34 = vpop.permute.xlu0 %324 }
 0x3d8   :  { %v337_v50 = vsel %vm336_vm4, %v325_v34, %v327_v33 }
 0x3d9   :  { %v345_v59 = vadd.f32 %v337_v50, %v303_v53 }
 0x3da   :  { %v335_v31 = vpop.permute.xlu1 %334 }
 0x3db   :  { %v329_v36 = vpop.permute.xlu0 %328  ;;  %v355_v10 = vsel %vm1249_vm5, %v345_v59, 0.0  ;;  %v340_v30 = vsel %vm336_vm4, %v333_v37, %v335_v31 }
 0x3dc   :  { %v338_v56 = vsel %vm336_vm4, %v327_v33, %v329_v36  ;;  %v348_v22 = vadd.f32 %v340_v30, %v306_v14 }
 0x3dd   :  { %v346_v1 = vadd.f32 %v338_v56, %v304_v58 }
 0x3de   :  { %v358_v36 = vsel %vm1260_vm9, %v348_v22, 0.0 }
 0x3df   :  { %v331_v38 = vpop.permute.xlu0 %330  ;;  %v356_v15 = vsel %vm1260_vm9, %v346_v1, 0.0  ;;  %v649_v1 = vld [vmem:[%s1377_s5] sm:$0xf] }
 0x3e0   :  { %v339_v61 = vsel %vm336_vm4, %v331_v38, %v333_v37 }
 0x3e1   :  { %v347_v8 = vadd.f32 %v339_v61, %v305_v0 }
 0x3e3   :  { %v357_v23 = vsel %vm1249_vm5, %v347_v8, 0.0 }
 0x41b   :  { %v481_v29 = vpop.permute.xlu0 %480 }
 0x41c   :  { %v479_v39 = vpop.permute.xlu1 %478 }
 0x41d   :  { %v490_v9 = vsel %vm488_vm7, %v479_v39, %v481_v29 }
 0x41e   :  { %v498_v45 = vadd.f32 %v490_v9, %v356_v15 }
 0x427   :  { %v625_v42 = vpop.permute.xlu0 %624 }
 0x428   :  { %v623_v43 = vpop.permute.xlu1 %622 }
 0x429   :  { %v634_v7 = vsel %vm632_vm6, %v623_v43, %v625_v42 }
 0x42a   :  { %v642_v17 = vsel %vm1267_vm10, %v634_v7, 0.0 }
 0x42b   :  { %v477_v48 = vpop.permute.xlu0 %476  ;;  %v646_v25 = vadd.f32 %v642_v17, %v498_v45 }
 0x42c   :  { %v483_v51 = vpop.permute.xlu1 %482  ;;  %v489_v26 = vsel %vm488_vm7, %v477_v48, %v479_v39 }
 0x42d   :  { %v497_v41 = vadd.f32 %v489_v26, %v355_v10  ;;  %v652_v38 = vsel %vm137_vm1, %v646_v25, 0.0 }
 0x42f   :  { %v621_v60 = vpop.permute.xlu0 %620 }
 0x430   :  { %v633_v62 = vsel %vm632_vm6, %v621_v60, %v623_v43  ;;  %v627_v63 = vpop.permute.xlu1 %626 }
 0x431   :  { %v641_v11 = vsel %vm1255_vm8, %v633_v62, 0.0 }
 0x432   :  { %v645_v12 = vadd.f32 %v641_v11, %v497_v41 }
 0x433   :  { %v485_v13 = vpop.permute.xlu0 %484 }
 0x434   :  { %v491_v18 = vsel %vm488_vm7, %v483_v51, %v485_v13  ;;  %v487_v21 = vpop.permute.xlu1 %486  ;;  %v651_v34 = vsel %vm137_vm1, %v645_v12, 0.0 }
 0x435   :  { %v499_v27 = vadd.f32 %v491_v18, %v357_v23  ;;  %v492_v32 = vsel %vm488_vm7, %v485_v13, %v487_v21  ;;  %v653_v40 = vadd.f32 %v652_v38, %v651_v34 }
 0x436   :  { %v500_v31 = vadd.f32 %v492_v32, %v358_v36 }
 0x437   :  { %v629_v24 = vpop.permute.xlu0 %628 }
 0x438   :  { %v635_v28 = vsel %vm632_vm6, %v627_v63, %v629_v24 }
 0x439   :  { %v643_v33 = vsel %vm1255_vm8, %v635_v28, 0.0 }
 0x43a   :  { %v647_v35 = vadd.f32 %v643_v33, %v499_v27 }
 0x43b   :  { %v631_v37 = vpop.permute.xlu0 %630 }
 0x43c   :  { %v636_v3 = vsel %vm632_vm6, %v629_v24, %v631_v37  ;;  %v654_v29 = vsel %vm137_vm1, %v647_v35, 0.0 }
 0x43d   :  { %v644_v39 = vsel %vm1267_vm10, %v636_v3, 0.0  ;;  %v655_v43 = vadd.f32 %v654_v29, %v653_v40 }
 0x43e   :  { %v648_v42 = vadd.f32 %v644_v39, %v500_v31 }
 0x440   :  { %v656_v44 = vsel %vm137_vm1, %v648_v42, 0.0 }
 0x441   :  { %v657_v46 = vadd.f32 %v656_v44, %v655_v43 }
 0x443   :  { %658 = vadd.xlane.f32.xlu1 %v657_v46 }
 0x454   :  { %693 = vperm.xlu1 %933, %v650_v47  }
 0x4d0   :  { %v659_v20 = vpop.xlane.xlu1 %658 }
 0x4d1   :  { %v660_v48 = vmul.f32 0.001953125, %v659_v20 }
 0x4d3   :  { %v661_v49 = vsub.f32 %v645_v12, %v660_v48  ;;  %v662_v50 = vsub.f32 %v646_v25, %v660_v48  ;;  %v663_v51 = vsub.f32 %v647_v35, %v660_v48  ;;  %v664_v52 = vsub.f32 %v648_v42, %v660_v48  ;;  %v935_v12 = vld [vmem:[%s1378_s7] sm:$0xff]  }
 0x4d4   :  { %v694_v9 = vpop.permute.xlu1 %693 }
 0x4d5   :  { %v665_v53 = vmul.f32 %v661_v49, %v661_v49  ;;  %v666_v54 = vmul.f32 %v662_v50, %v662_v50  ;;  %v667_v55 = vmul.f32 %v663_v51, %v663_v51  ;;  %v668_v56 = vmul.f32 %v664_v52, %v664_v52 }
 0x4d7   :  { %v669_v57 = vsel %vm137_vm1, %v665_v53, 0.0  ;;  %v670_v58 = vsel %vm137_vm1, %v666_v54, 0.0  ;;  %v672_v59 = vsel %vm137_vm1, %v667_v55, 0.0  ;;  %v674_v61 = vsel %vm137_vm1, %v668_v56, 0.0 }
 0x4d8   :  { %v671_v16 = vadd.f32 %v670_v58, %v669_v57 }
 0x4da   :  { %v673_v60 = vadd.f32 %v672_v59, %v671_v16 }
 0x4dc   :  { %v675_v19 = vadd.f32 %v674_v61, %v673_v60 }
 0x4de   :  { %676 = vadd.xlane.f32.xlu0 %v675_v19 }
 0x56b   :  { %v677_v62 = vpop.xlane.xlu0 %676 }
 0x56c   :  { %v678_v63 = vmul.f32 0.001953125, %v677_v62 }
 0x56e   :  { %v679_v0 = vadd.f32 1e-05, %v678_v63 }
 0x570   :  { %938 = vrsqrt.f32 %v679_v0 }
 0x57a   :  { %v939_v2 = vpop.eup %938 }
 0x57b   :  { %v681_v26 = vmul.f32 %v939_v2, %v649_v1 }
 0x57d   :  { %684 = vperm.xlu0 %934, %v681_v26   ;;  %v814_v26 = vld [vmem:[%s1379_s8] sm:$0xff] }
 0x5fc   :  { %v685_v4 = vpop.permute.xlu0 %684 }
 0x5fd   :  { %v687_v5 = vmul.f32 %v685_v4, %v661_v49  ;;  %v688_v6 = vmul.f32 %v685_v4, %v662_v50  ;;  %v689_v7 = vmul.f32 %v685_v4, %v663_v51  ;;  %v690_v8 = vmul.f32 %v685_v4, %v664_v52 }
 0x5ff   :  { %v697_v10 = vadd.f32 %v694_v9, %v688_v6  ;;  %v699_v11 = vadd.f32 %v694_v9, %v690_v8  ;;  %v696_v13 = vadd.f32 %v694_v9, %v687_v5  ;;  %v698_v30 = vadd.f32 %v694_v9, %v689_v7  ;;  %v815_v5 = vld [vmem:[%s1379_s8 + $0x8] sm:$0xff] }
 0x600   :  { %v817_v9 = vld [vmem:[%s1380_s9 + $0x8] sm:$0xff] }
 0x601   :  { %v703_v41 = vpack.c.bf16 %v697_v10, %v697_v10  ;;  %v705_v14 = vpack.c.bf16 %v699_v11, %v699_v11  ;;  %v702_v15 = vpack.c.bf16 %v696_v13, %v696_v13  ;;  %v704_v17 = vpack.c.bf16 %v698_v30, %v698_v30  ;;  %v816_v10 = vld [vmem:[%s1380_s9] sm:$0xff] }
 0x603   :  { %923 = vmatprep.subr.msk.bf16.mxu0 %vm715_vm11, %v703_v41  ;;  %925 = vmatprep.subr.msk.bf16.mxu1 %vm715_vm11, %v705_v14  ;;  %v717_v18 = vsel %vm715_vm11, %v702_v15, 0  ;;  %v766_v45 = vsel %vm715_vm11, %v704_v17, 0 }
 0x604   :  { %723 = vmatpush1.bf16.msra.mxu0 %v717_v18  ;;  %772 = vmatpush1.bf16.msra.mxu1 %v766_v45 }
 0x607   :  { %924 = vmatmul.mubr.msk.bf16.vlgmr.msra.gmra.mrb[4].mxu0 %vm711_vm12, %v935_v12  ;;  %926 = vmatmul.mubr.msk.bf16.vlgmr.msra.gmra.mrb[4].mxu1 %vm711_vm12, %v935_v12 }
 0x6da   :  { %v756_v21 = vpop.f32.mrb[4].mxu0  ;;  %v805_v22 = vpop.f32.mrb[4].mxu1 }
 0x6db   :  { %v758_v23 = vpop.f32.mrb[5].mxu0  ;;  %v807_v24 = vpop.f32.mrb[5].mxu1 }
 0x6dc   :  { %v818_v25 = vadd.f32 %v758_v23, %v756_v21  ;;  %v760_v27 = vpop.f32.mrb[6].mxu0  ;;  %v809_v28 = vpop.f32.mrb[6].mxu1 }
 0x6dd   :  { %v762_v32 = vpop.f32.mrb[7].mxu0  ;;  %v811_v33 = vpop.f32.mrb[7].mxu1 }
 0x6de   :  { %v823_v34 = vadd.f32 %v762_v32, %v760_v27  ;;  %v819_v35 = vadd.f32 %v818_v25, %v805_v22 }
 0x6e0   :  { %v824_v36 = vadd.f32 %v823_v34, %v809_v28  ;;  %v820_v37 = vadd.f32 %v819_v35, %v807_v24  ;;  %v946_v35 = vld [vmem:[%s1371_s0 + $0x30] sm:$0xff] }
 0x6e2   :  { %v825_v38 = vadd.f32 %v824_v36, %v811_v33  ;;  %821 = vadd.xlane.f32.xlu1 %v820_v37  ;;  %v947_v37 = vld [vmem:[%s1371_s0 + $0x38] sm:$0xff] }
 0x6e4   :  { %826 = vadd.xlane.f32.xlu0 %v825_v38 }
 0x76f   :  { %v822_v31 = vpop.xlane.xlu1 %821 }
 0x770   :  { %v828_v3 = vmul.f32 0.001953125, %v822_v31 }
 0x771   :  { %v827_v29 = vpop.xlane.xlu0 %826 }
 0x772   :  { %v830_v39 = vsub.f32 %v756_v21, %v828_v3  ;;  %v831_v40 = vsub.f32 %v758_v23, %v828_v3  ;;  %v829_v42 = vmul.f32 0.001953125, %v827_v29  ;;  %v834_v43 = vsub.f32 %v805_v22, %v828_v3 }
 0x773   :  { %v835_v44 = vsub.f32 %v807_v24, %v828_v3 }
 0x774   :  { %v832_v46 = vsub.f32 %v760_v27, %v829_v42  ;;  %v833_v47 = vsub.f32 %v762_v32, %v829_v42  ;;  %v838_v20 = vmul.f32 %v830_v39, %v830_v39  ;;  %v839_v48 = vmul.f32 %v831_v40, %v831_v40 }
 0x775   :  { %v842_v49 = vmul.f32 %v834_v43, %v834_v43  ;;  %v836_v50 = vsub.f32 %v809_v28, %v829_v42  ;;  %v837_v52 = vsub.f32 %v811_v33, %v829_v42  ;;  %v843_v55 = vmul.f32 %v835_v44, %v835_v44  ;;  %v944_v28 = vld [vmem:[%s1371_s0 + $0x10] sm:$0xff]  ;;  %v945_v33 = vld [vmem:[%s1371_s0 + $0x18] sm:$0xff] }
 0x776   :  { %v846_v51 = vadd.f32 %v839_v48, %v838_v20  ;;  %v840_v53 = vmul.f32 %v832_v46, %v832_v46  ;;  %v841_v54 = vmul.f32 %v833_v47, %v833_v47  ;;  %v951_v20 = vld [vmem:[%s1371_s0 + $0x28] sm:$0xff] }
 0x777   :  { %v844_v57 = vmul.f32 %v836_v50, %v836_v50  ;;  %v845_v59 = vmul.f32 %v837_v52, %v837_v52 }
 0x778   :  { %v847_v56 = vadd.f32 %v846_v51, %v842_v49  ;;  %v851_v58 = vadd.f32 %v841_v54, %v840_v53 }
 0x77a   :  { %v848_v16 = vadd.f32 %v847_v56, %v843_v55  ;;  %v852_v60 = vadd.f32 %v851_v58, %v844_v57 }
 0x77c   :  { %849 = vadd.xlane.f32.xlu0 %v848_v16  ;;  %v853_v61 = vadd.f32 %v852_v60, %v845_v59 }
 0x77e   :  { %854 = vadd.xlane.f32.xlu1 %v853_v61 }
 0x809   :  { %v850_v19 = vpop.xlane.xlu0 %849 }
 0x80a   :  { %v856_v62 = vmul.f32 0.001953125, %v850_v19 }
 0x80b   :  { %v855_v63 = vpop.xlane.xlu1 %854 }
 0x80c   :  { %v858_v0 = vadd.f32 1e-05, %v856_v62  ;;  %v857_v1 = vmul.f32 0.001953125, %v855_v63 }
 0x80e   :  { %940 = vrsqrt.f32 %v858_v0  ;;  %v859_v2 = vadd.f32 1e-05, %v857_v1 }
 0x810   :  { %942 = vrsqrt.f32 %v859_v2 }
 0x818   :  { %v941_v4 = vpop.eup %940 }
 0x819   :  { %v862_v6 = vmul.f32 %v941_v4, %v814_v26 }
 0x81a   :  { %v943_v7 = vpop.eup %942 }
 0x81b   :  { %866 = vperm.xlu0 %934, %v862_v6   ;;  %v863_v8 = vmul.f32 %v943_v7, %v815_v5 }
 0x81d   :  { %871 = vperm.xlu1 %933, %v863_v8  }
 0x81f   :  { %889 = vperm.xlu0 %934, %v817_v9  }
 0x821   :  { %884 = vperm.xlu1 %933, %v816_v10  }
 0x89a   :  { %v867_v11 = vpop.permute.xlu0 %866 }
 0x89b   :  { %v874_v23 = vmul.f32 %v867_v11, %v830_v39  ;;  %v875_v24 = vmul.f32 %v867_v11, %v831_v40  ;;  %v878_v25 = vmul.f32 %v867_v11, %v834_v43  ;;  %v879_v27 = vmul.f32 %v867_v11, %v835_v44  ;;  %v948_v40 = vld [vmem:[%s1371_s0] sm:$0xff]  ;;  %v949_v43 = vld [vmem:[%s1371_s0 + $0x8] sm:$0xff] }
 0x89c   :  { %v872_v13 = vpop.permute.xlu1 %871 }
 0x89d   :  { %v876_v30 = vmul.f32 %v872_v13, %v832_v46  ;;  %v877_v41 = vmul.f32 %v872_v13, %v833_v47  ;;  %v880_v14 = vmul.f32 %v872_v13, %v836_v50  ;;  %v881_v15 = vmul.f32 %v872_v13, %v837_v52  ;;  %v950_v46 = vld [vmem:[%s1371_s0 + $0x20] sm:$0xff] }
 0x89e   :  { %v890_v17 = vpop.permute.xlu0 %889 }
 0x89f   :  { %v894_v18 = vadd.f32 %v890_v17, %v876_v30  ;;  %v895_v45 = vadd.f32 %v890_v17, %v877_v41  ;;  %v898_v12 = vadd.f32 %v890_v17, %v880_v14  ;;  %v899_v21 = vadd.f32 %v890_v17, %v881_v15 }
 0x8a0   :  { %v885_v22 = vpop.permute.xlu1 %884 }
 0x8a1   :  { %v902_v32 = vadd.f32 %v944_v28, %v894_v18  ;;  %v903_v34 = vadd.f32 %v945_v33, %v895_v45  ;;  %v906_v36 = vadd.f32 %v946_v35, %v898_v12  ;;  %v907_v38 = vadd.f32 %v947_v37, %v899_v21 }
 0x8a2   :  { %v892_v31 = vadd.f32 %v885_v22, %v874_v23  ;;  %v893_v3 = vadd.f32 %v885_v22, %v875_v24  ;;  %v896_v29 = vadd.f32 %v885_v22, %v878_v25  ;;  %v897_v39 = vadd.f32 %v885_v22, %v879_v27 }
 0x8a3   :  { %910 = vst [vmem:[%s1381_s10 + $0x10] sm:$0xff] %v902_v32  ;;  %911 = vst [vmem:[%s1381_s10 + $0x18] sm:$0xff] %v903_v34 }
 0x8a4   :  { %914 = vst [vmem:[%s1381_s10 + $0x30] sm:$0xff] %v906_v36  ;;  %915 = vst [vmem:[%s1381_s10 + $0x38] sm:$0xff] %v907_v38  ;;  %v900_v42 = vadd.f32 %v948_v40, %v892_v31  ;;  %v901_v44 = vadd.f32 %v949_v43, %v893_v3  ;;  %v904_v47 = vadd.f32 %v950_v46, %v896_v29 }
 0x8a5   :  { %v905_v48 = vadd.f32 %v951_v20, %v897_v39 }
 0x8a6   :  { %908 = vst [vmem:[%s1381_s10] sm:$0xff] %v900_v42  ;;  %909 = vst [vmem:[%s1381_s10 + $0x8] sm:$0xff] %v901_v44 }
 0x8a7   :  { %912 = vst [vmem:[%s1381_s10 + $0x20] sm:$0xff] %v904_v47  ;;  %913 = vst [vmem:[%s1381_s10 + $0x28] sm:$0xff] %v905_v48 }

</bundles_post_ra>
